<compile_context>
chip_gen: v7x
topology: tpu7x:2x2x1
jax: 0.10.0
libtpu: 0.0.40
codegen_flags: <defaults>
</compile_context>

<pallas_src>
import functools

import jax
import jax.numpy as jnp
from jax.experimental import pallas as pl
from jax.experimental.pallas import tpu as pltpu

HIDDEN = 200          # fixed by the PyTorch module
HIDDEN_PAD = 256      # padded: 1 clean MXU tile on v6e/v7x, 2 on v5e
LANE = 128
SUBLANE_BF16 = 16     # bf16 packs 16 rows per vreg


def _round_up(x, m):
    return ((x + m - 1) // m) * m


def _mlp_kernel(x_ref, w1_ref, b1_ref, w2_ref, b2_ref, w3_ref, b3_ref, o_ref):
    """Fused 3-layer MLP forward on one batch tile.

    x arrives as f32 (no wrapper-side cast pass); it is cast to bf16 here so
    matmul operands are MXU-native while accumulation stays f32 via
    preferred_element_type.  Bias-add / ReLU run in f32 on the VPU.  Weights
    and biases use constant index maps so they stay VMEM-resident across the
    (parallel) batch grid.
    """
    x = x_ref[...].astype(jnp.bfloat16)                            # (TB, Din_p)

    h1 = jnp.dot(x, w1_ref[...], preferred_element_type=jnp.float32)
    h1 = jnp.maximum(h1 + b1_ref[...], 0.0).astype(jnp.bfloat16)   # (TB, 256)

    h2 = jnp.dot(h1, w2_ref[...], preferred_element_type=jnp.float32)
    h2 = jnp.maximum(h2 + b2_ref[...], 0.0).astype(jnp.bfloat16)   # (TB, 256)

    out = jnp.dot(h2, w3_ref[...], preferred_element_type=jnp.float32)
    o_ref[...] = (out + b3_ref[...]).astype(o_ref.dtype)           # (TB, Dout_p)


def prepare_params(params):
    """One-time weight prep: transpose to (in, out), zero-pad to lane-aligned
    shapes, cast matmul operands to bf16 (biases stay f32)."""
    d_in = params["w1"].shape[1]
    d_out = params["w3"].shape[0]
    d_in_p = _round_up(d_in, LANE)
    d_out_p = _round_up(d_out, LANE)

    def pad2(a, rows, cols):
        return jnp.pad(a, ((0, rows - a.shape[0]), (0, cols - a.shape[1])))

    w1 = pad2(params["w1"].T, d_in_p, HIDDEN_PAD).astype(jnp.bfloat16)
    w2 = pad2(params["w2"].T, HIDDEN_PAD, HIDDEN_PAD).astype(jnp.bfloat16)
    w3 = pad2(params["w3"].T, HIDDEN_PAD, d_out_p).astype(jnp.bfloat16)
    b1 = pad2(params["b1"].reshape(1, -1).astype(jnp.float32), 1, HIDDEN_PAD)
    b2 = pad2(params["b2"].reshape(1, -1).astype(jnp.float32), 1, HIDDEN_PAD)
    b3 = pad2(params["b3"].reshape(1, -1).astype(jnp.float32), 1, d_out_p)
    prep = dict(w1=w1, b1=b1, w2=w2, b2=b2, w3=w3, b3=b3)
    return prep, d_out


def _pick_batch_tile(B, d_in_p):
    """Batch-tile selection (perf review):
      * small batches: one tile, rounded to 16 rows (bf16 sublane packing)
      * large batches: 512-row tiles to amortize ~0.35 us/step grid overhead,
        capped so the f32 input tile stays <= 4 MiB (double-buffered input +
        weights + output fits v5e's 16 MiB scoped-VMEM default)
      * keep >= 2 grid steps so the 'parallel' axis can shard over v7x's 2 TCs.
    """
    if B <= 256:
        return _round_up(B, SUBLANE_BF16)
    cap = max(LANE, ((4 << 20) // (d_in_p * 4)) // LANE * LANE)
    tb = min(512, cap)
    while tb > LANE and _round_up(B, tb) < 2 * tb:
        tb //= 2
    return tb


@functools.partial(jax.jit, static_argnames=("d_out",))
def mlp_forward(x_nchw, prep, *, d_out):
    """Forward matching MLP.forward(x): x.view(B,-1) -> fc1/ReLU -> fc2/ReLU -> fc3."""
    B = x_nchw.shape[0]
    x2d = x_nchw.reshape(B, -1).astype(jnp.float32)   # x.view(B, -1); stays f32
    d_in = x2d.shape[1]

    w1, b1, w2, b2, w3, b3 = (prep[k] for k in ("w1", "b1", "w2", "b2", "w3", "b3"))
    d_in_p = w1.shape[0]
    d_out_p = w3.shape[1]

    tb = _pick_batch_tile(B, d_in_p)
    b_p = _round_up(B, tb)

    # Pad only if actually unaligned (no dtype cast here -> no extra HBM pass).
    pad_b, pad_d = b_p - B, d_in_p - d_in
    if pad_b or pad_d:
        x2d = jnp.pad(x2d, ((0, pad_b), (0, pad_d)))

    const = lambda shape: pl.BlockSpec(shape, lambda i: (0, 0))

    out_p = pl.pallas_call(
        _mlp_kernel,
        out_shape=jax.ShapeDtypeStruct((b_p, d_out_p), jnp.float32),
        grid=(b_p // tb,),
        in_specs=[
            pl.BlockSpec((tb, d_in_p), lambda i: (i, 0)),      # x: batch-tiled, f32
            const((d_in_p, HIDDEN_PAD)),                       # w1 (VMEM-resident)
            const((1, HIDDEN_PAD)),                            # b1
            const((HIDDEN_PAD, HIDDEN_PAD)),                   # w2
            const((1, HIDDEN_PAD)),                            # b2
            const((HIDDEN_PAD, d_out_p)),                      # w3
            const((1, d_out_p)),                               # b3
        ],
        out_specs=pl.BlockSpec((tb, d_out_p), lambda i: (i, 0)),
        compiler_params=pltpu.CompilerParams(
            dimension_semantics=("parallel",)),                # v7x: shard 2 TCs
    )(x2d, w1, b1, w2, b2, w3, b3)

    return out_p[:B, :d_out]


def init_params(key, input_size, output_size):
    """Deterministic synthetic init (PyTorch-style shapes: weight = (out, in))."""
    ks = jax.random.split(key, 6)

    def linear(kw, kb, fan_in, fan_out):
        bound = 1.0 / jnp.sqrt(fan_in)
        w = jax.random.uniform(kw, (fan_out, fan_in), jnp.float32, -bound, bound)
        b = jax.random.uniform(kb, (fan_out,), jnp.float32, -bound, bound)
        return w, b

    w1, b1 = linear(ks[0], ks[1], input_size, HIDDEN)
    w2, b2 = linear(ks[2], ks[3], HIDDEN, HIDDEN)
    w3, b3 = linear(ks[4], ks[5], HIDDEN, output_size)
    return dict(w1=w1, b1=b1, w2=w2, b2=b2, w3=w3, b3=b3)


def mlp_reference(x_nchw, params):
    """Pure-JAX f32 reference matching the PyTorch forward exactly."""
    x = x_nchw.reshape(x_nchw.shape[0], -1)
    x = jnp.maximum(x @ params["w1"].T + params["b1"], 0.0)
    x = jnp.maximum(x @ params["w2"].T + params["b2"], 0.0)
    x = x @ params["w3"].T + params["b3"]
    return x


if __name__ == "__main__":
    key = jax.random.PRNGKey(0)
    k_x, k_p = jax.random.split(key)

    # Small CIFAR-like input: batch=2, channels=4, spatial=16 -> input_size=1024
    B, C, H, W = 2, 4, 16, 16
    input_size = C * H * W
    output_size = 10

    x = jax.random.normal(k_x, (B, C, H, W), jnp.float32)
    params = init_params(k_p, input_size, output_size)

    prep, d_out = prepare_params(params)           # one-time weight prep
    out = mlp_forward(x, prep, d_out=d_out)
    out = jax.block_until_ready(out)

    ref = mlp_reference(x, params)
    assert out.shape == (B, output_size), out.shape
    # bf16 operands (f32 accumulation) -> looser tolerance vs the f32 reference.
    assert jnp.allclose(out, ref, atol=5e-2, rtol=5e-2), "mismatch vs reference"

    print("KERNEL_OK")
</pallas_src>

<mosaic_0001>
module attributes {stable_mosaic.version = 11 : i64} {
  func.func @_mlp_kernel(%arg0: i32, %arg1: memref<16x1024xf32, #tpu.memory_space<vmem>>, %arg2: memref<1024x256xbf16, #tpu.memory_space<vmem>>, %arg3: memref<1x256xf32, #tpu.memory_space<vmem>>, %arg4: memref<256x256xbf16, #tpu.memory_space<vmem>>, %arg5: memref<1x256xf32, #tpu.memory_space<vmem>>, %arg6: memref<256x128xbf16, #tpu.memory_space<vmem>>, %arg7: memref<1x128xf32, #tpu.memory_space<vmem>>, %arg8: memref<16x128xf32, #tpu.memory_space<vmem>>) attributes {dimension_semantics = [#tpu.dimension_semantics<parallel>], iteration_bounds = array<i64: 1>, scalar_prefetch = 0 : i64, scratch_operands = 0 : i64, tpu.core_type = #tpu.core_type<tc>, window_params = [{transform_indices = @transform_0, window_bounds = array<i64: 16, 1024>}, {pipeline_mode = #tpu.pipeline_mode<synchronous>, transform_indices = @transform_1, window_bounds = array<i64: 1024, 256>}, {pipeline_mode = #tpu.pipeline_mode<synchronous>, transform_indices = @transform_2, window_bounds = array<i64: 1, 256>}, {pipeline_mode = #tpu.pipeline_mode<synchronous>, transform_indices = @transform_3, window_bounds = array<i64: 256, 256>}, {pipeline_mode = #tpu.pipeline_mode<synchronous>, transform_indices = @transform_4, window_bounds = array<i64: 1, 256>}, {pipeline_mode = #tpu.pipeline_mode<synchronous>, transform_indices = @transform_5, window_bounds = array<i64: 256, 128>}, {pipeline_mode = #tpu.pipeline_mode<synchronous>, transform_indices = @transform_6, window_bounds = array<i64: 1, 128>}, {transform_indices = @transform_7, window_bounds = array<i64: 16, 128>}]} {
    %c0 = arith.constant 0 : index
    %c0_0 = arith.constant 0 : index
    %0 = vector.load %arg1[%c0, %c0_0] : memref<16x1024xf32, #tpu.memory_space<vmem>>, vector<16x1024xf32>
    %1 = arith.truncf %0 : vector<16x1024xf32> to vector<16x1024xbf16>
    %c0_1 = arith.constant 0 : index
    %c0_2 = arith.constant 0 : index
    %2 = vector.load %arg2[%c0_1, %c0_2] : memref<1024x256xbf16, #tpu.memory_space<vmem>>, vector<1024x256xbf16>
    %cst = arith.constant dense<0.000000e+00> : vector<16x256xf32>
    %3 = tpu.matmul %1, %2, %cst {dimension_numbers = #tpu.dot_dimension_numbers<[1], [0], [0], [1], [0, 0, 1, 1], [], []>} : vector<16x1024xbf16>, vector<1024x256xbf16>, vector<16x256xf32> -> vector<16x256xf32>
    %c0_3 = arith.constant 0 : index
    %c0_4 = arith.constant 0 : index
    %4 = vector.load %arg3[%c0_3, %c0_4] : memref<1x256xf32, #tpu.memory_space<vmem>>, vector<1x256xf32>
    %5 = vector.broadcast %4 : vector<1x256xf32> to vector<16x256xf32>
    %6 = arith.addf %3, %5 : vector<16x256xf32>
    %cst_5 = arith.constant 0.000000e+00 : f32
    %7 = vector.broadcast %cst_5 : f32 to vector<16x256xf32>
    %8 = arith.maximumf %6, %7 : vector<16x256xf32>
    %9 = arith.truncf %8 : vector<16x256xf32> to vector<16x256xbf16>
    %c0_6 = arith.constant 0 : index
    %c0_7 = arith.constant 0 : index
    %10 = vector.load %arg4[%c0_6, %c0_7] : memref<256x256xbf16, #tpu.memory_space<vmem>>, vector<256x256xbf16>
    %cst_8 = arith.constant dense<0.000000e+00> : vector<16x256xf32>
    %11 = tpu.matmul %9, %10, %cst_8 {dimension_numbers = #tpu.dot_dimension_numbers<[1], [0], [0], [1], [0, 0, 1, 1], [], []>} : vector<16x256xbf16>, vector<256x256xbf16>, vector<16x256xf32> -> vector<16x256xf32>
    %c0_9 = arith.constant 0 : index
    %c0_10 = arith.constant 0 : index
    %12 = vector.load %arg5[%c0_9, %c0_10] : memref<1x256xf32, #tpu.memory_space<vmem>>, vector<1x256xf32>
    %13 = vector.broadcast %12 : vector<1x256xf32> to vector<16x256xf32>
    %14 = arith.addf %11, %13 : vector<16x256xf32>
    %cst_11 = arith.constant 0.000000e+00 : f32
    %15 = vector.broadcast %cst_11 : f32 to vector<16x256xf32>
    %16 = arith.maximumf %14, %15 : vector<16x256xf32>
    %17 = arith.truncf %16 : vector<16x256xf32> to vector<16x256xbf16>
    %c0_12 = arith.constant 0 : index
    %c0_13 = arith.constant 0 : index
    %18 = vector.load %arg6[%c0_12, %c0_13] : memref<256x128xbf16, #tpu.memory_space<vmem>>, vector<256x128xbf16>
    %cst_14 = arith.constant dense<0.000000e+00> : vector<16x128xf32>
    %19 = tpu.matmul %17, %18, %cst_14 {dimension_numbers = #tpu.dot_dimension_numbers<[1], [0], [0], [1], [0, 0, 1, 1], [], []>} : vector<16x256xbf16>, vector<256x128xbf16>, vector<16x128xf32> -> vector<16x128xf32>
    %c0_15 = arith.constant 0 : index
    %c0_16 = arith.constant 0 : index
    %20 = vector.load %arg7[%c0_15, %c0_16] : memref<1x128xf32, #tpu.memory_space<vmem>>, vector<1x128xf32>
    %21 = vector.broadcast %20 : vector<1x128xf32> to vector<16x128xf32>
    %22 = arith.addf %19, %21 : vector<16x128xf32>
    %c0_17 = arith.constant 0 : index
    %c0_18 = arith.constant 0 : index
    %23 = vector.load %arg8[%c0_17, %c0_18] : memref<16x128xf32, #tpu.memory_space<vmem>>, vector<16x128xf32>
    tpu.vector_store %arg8[%c0_17, %c0_18], %22 {strides = array<i32>} : memref<16x128xf32, #tpu.memory_space<vmem>>, vector<16x128xf32>,
    return
  }
  func.func @transform_0(%arg0: i32) -> (i32, i32) {
    %c0_i32 = arith.constant 0 : i32
    %c0_i32_0 = arith.constant 0 : i32
    return %arg0, %c0_i32 : i32, i32
  }
  func.func @transform_1(%arg0: i32) -> (i32, i32) {
    %c0_i32 = arith.constant 0 : i32
    %c0_i32_0 = arith.constant 0 : i32
    %c0_i32_1 = arith.constant 0 : i32
    return %c0_i32, %c0_i32_0 : i32, i32
  }
  func.func @transform_2(%arg0: i32) -> (i32, i32) {
    %c0_i32 = arith.constant 0 : i32
    %c0_i32_0 = arith.constant 0 : i32
    %c0_i32_1 = arith.constant 0 : i32
    return %c0_i32, %c0_i32_0 : i32, i32
  }
  func.func @transform_3(%arg0: i32) -> (i32, i32) {
    %c0_i32 = arith.constant 0 : i32
    %c0_i32_0 = arith.constant 0 : i32
    %c0_i32_1 = arith.constant 0 : i32
    return %c0_i32, %c0_i32_0 : i32, i32
  }
  func.func @transform_4(%arg0: i32) -> (i32, i32) {
    %c0_i32 = arith.constant 0 : i32
    %c0_i32_0 = arith.constant 0 : i32
    %c0_i32_1 = arith.constant 0 : i32
    return %c0_i32, %c0_i32_0 : i32, i32
  }
  func.func @transform_5(%arg0: i32) -> (i32, i32) {
    %c0_i32 = arith.constant 0 : i32
    %c0_i32_0 = arith.constant 0 : i32
    %c0_i32_1 = arith.constant 0 : i32
    return %c0_i32, %c0_i32_0 : i32, i32
  }
  func.func @transform_6(%arg0: i32) -> (i32, i32) {
    %c0_i32 = arith.constant 0 : i32
    %c0_i32_0 = arith.constant 0 : i32
    %c0_i32_1 = arith.constant 0 : i32
    return %c0_i32, %c0_i32_0 : i32, i32
  }
  func.func @transform_7(%arg0: i32) -> (i32, i32) {
    %c0_i32 = arith.constant 0 : i32
    %c0_i32_0 = arith.constant 0 : i32
    return %arg0, %c0_i32 : i32, i32
  }
}

</mosaic_0001>

<bundles_post_ra>
// kernel: mlp_forward.1
= control target key start
LH: loop header
LB: loop body
LE: loop exit
PB: predicated region body
PF: predicated region fallthrough
CT: control target
= control target key end

     0   :  { %12 = vsyncpa [#allocation3], 0  ;;  %s2228_s0 = inlined_call_operand.vmem [shape: f32[16,1024], index: 0, kind: input, shape index: {}]   ;;  %s2229_s1 = inlined_call_operand.hbm [shape: bf16[1024,256], index: 1, kind: input, shape index: {}]   ;;  %s2230_s2 = inlined_call_operand.vmem [shape: f32[1,256], index: 2, kind: input, shape index: {}]   ;;  %s2231_s3 = inlined_call_operand.vmem [shape: bf16[256,256], index: 3, kind: input, shape index: {}]   ;;  %s2232_s4 = inlined_call_operand.vmem [shape: f32[1,256], index: 4, kind: input, shape index: {}]   ;;  %s2233_s5 = inlined_call_operand.hbm [shape: bf16[256,128], index: 5, kind: input, shape index: {}]   ;;  %s2234_s6 = inlined_call_operand.vmem [shape: f32[1,128], index: 6, kind: input, shape index: {}]   ;;  %s2235_s7 = inlined_call_operand.vmem [shape: f32[16,128], index: 7, kind: output, shape index: {}]  }
   0x1   :  { %13 = vsyncpa [#allocation5], 0  ;;  %s1999_s24 = smov [#allocation2]   ;;  %s1951_s28 = scalar_lea.hbm %s2229_s1, 16384 }
   0x2   :  { %s21_s25 = sshll.u32 %s1999_s24, 4  ;;  %p1952_p0 = scmp.ne.s32.totalorder %s2229_s1, %s1951_s28  ;;  %s22_s25 = int_to_ptr.vmem [resolvable:$true] %s21_s25 }
   0x3   :  { %p1955_p1 = scmp.lt.u32.totalorder %s1951_s28, %s2229_s1 }
   0x5   :  { %p1957_p2 = pnand %p1955_p1, %p1952_p0 }
   0x7   :  { %1960 = shalt.err (!%p1957_p2)
}
   0x8   :  { %s1961_s10 = scalar_lea.vmem %s22_s25, 16384  ;;  %p1966_p4 = scmp.lt.s32.totalorder %s22_s25, %s22_s25 }
   0x9   :  { %p1962_p3 = scmp.ne.s32.totalorder %s22_s25, %s1961_s10  ;;  %p1967_p5 = scmp.lt.s32.totalorder %s1961_s10, %s1961_s10 }
   0xb   :  { %p1968_p6 = por %p1967_p5, %p1966_p4 }
   0xd   :  { %p1969_p7 = pnand %p1968_p6, %p1962_p3 }
   0xf   :  { %1972 = shalt.err (!%p1969_p7)
}
  0x10   :  { %s2000_s11 = smov 128   ;;  %s2001_s12 = smov 8  }
  0x11   :  { %27 = dma.hbm_to_vmem [thread:$0]  %s2229_s1, 16384, %s22_s25, [#allocation3], %s2000_s11, %s2000_s11, %s2001_s12  }
  0x12   :  { %s2002_s15 = smov [#allocation4]   ;;  %s1973_s19 = scalar_lea.hbm %s2233_s5, 2048 }
  0x13   :  { %s39_s16 = sshll.u32 %s2002_s15, 4  ;;  %p1974_p8 = scmp.ne.s32.totalorder %s2233_s5, %s1973_s19  ;;  %s40_s16 = int_to_ptr.vmem [resolvable:$true] %s39_s16 }
  0x14   :  { %p1977_p9 = scmp.lt.u32.totalorder %s1973_s19, %s2233_s5 }
  0x16   :  { %p1979_p10 = pnand %p1977_p9, %p1974_p8 }
  0x18   :  { %1982 = shalt.err (!%p1979_p10)
}
  0x19   :  { %s1983_s24 = scalar_lea.vmem %s40_s16, 2048  ;;  %p1988_p12 = scmp.lt.s32.totalorder %s40_s16, %s40_s16 }
  0x1a   :  { %p1984_p11 = scmp.ne.s32.totalorder %s40_s16, %s1983_s24  ;;  %p1989_p13 = scmp.lt.s32.totalorder %s1983_s24, %s1983_s24 }
  0x1c   :  { %p1990_p0 = por %p1989_p13, %p1988_p12 }
  0x1e   :  { %p1991_p1 = pnand %p1990_p0, %p1984_p11 }
  0x20   :  { %1994 = shalt.err (!%p1991_p1)
}
  0x21   :  { %s2003_s1 = smov 64   ;;  %s2004_s25 = smov 4  }
  0x22   :  { %45 = dma.hbm_to_vmem [thread:$0]  %s2233_s5, 2048, %s40_s16, [#allocation5], %s2003_s1, %s2003_s1, %s2004_s25  }
  0x23   :  { %1995 = dma.done.wait [#allocation3], 16384  }
  0x24   :  { %1996 = vsyncadd [#allocation3], 4294950912 }
  0x25   :  { %1997 = dma.done.wait [#allocation5], 2048  }
  0x26   :  { %1998 = vsyncadd [#allocation5], 4294965248  ;;  %v1695_v0 = vld [vmem:[#allocation2 + $0x104] ss:$8 sps:$4 sm:$0xff]   ;;  %v1697_v1 = vld [vmem:[#allocation2 + $0x100] ss:$8 sps:$4 sm:$0xff]  }
  0x27   :  { %902 = vmatprep.subr.bf16.mxu0 %v1695_v0  ;;  %v1698_v2 = vld [vmem:[#allocation2 + $0x114] ss:$8 sps:$4 sm:$0xff]   ;;  %v1700_v3 = vld [vmem:[#allocation2 + $0x110] ss:$8 sps:$4 sm:$0xff]   ;;  %v1701_v4 = vld [vmem:[#allocation2 + $0x124] ss:$8 sps:$4 sm:$0xff]  }
  0x28   :  { %903 = vmatpush1.bf16.msra.mxu0 %v1697_v1  ;;  %v1703_v5 = vld [vmem:[#allocation2 + $0x120] ss:$8 sps:$4 sm:$0xff]   ;;  %v1704_v6 = vld [vmem:[#allocation2 + $0x134] ss:$8 sps:$4 sm:$0xff]   ;;  %v1706_v7 = vld [vmem:[#allocation2 + $0x130] ss:$8 sps:$4 sm:$0xff]  }
  0x29   :  { %904 = vmatprep.subr.bf16.mxu0 %v1698_v2  ;;  %v1707_v8 = vld [vmem:[#allocation2 + $0x144] ss:$8 sps:$4 sm:$0xff]   ;;  %v1709_v9 = vld [vmem:[#allocation2 + $0x140] ss:$8 sps:$4 sm:$0xff]   ;;  %v1710_v10 = vld [vmem:[#allocation2 + $0x154] ss:$8 sps:$4 sm:$0xff]  }
  0x2a   :  { %v1712_v11 = vld [vmem:[#allocation2 + $0x150] ss:$8 sps:$4 sm:$0xff]   ;;  %v1713_v12 = vld [vmem:[#allocation2 + $0x164] ss:$8 sps:$4 sm:$0xff]   ;;  %v1715_v16 = vld [vmem:[#allocation2 + $0x160] ss:$8 sps:$4 sm:$0xff]  }
  0x2b   :  { %v58_v13 = vld [vmem:[%s2228_s0 + $0x18] sm:$0xff]  ;;  %v1719_v19 = vld [vmem:[#allocation2 + $0x184] ss:$8 sps:$4 sm:$0xff]   ;;  %v1721_v20 = vld [vmem:[#allocation2 + $0x180] ss:$8 sps:$4 sm:$0xff]  }
  0x2c   :  { %905 = vmatpush1.bf16.msra.mxu0 %v1700_v3  ;;  %v66_v14 = vld [vmem:[%s2228_s0 + $0x58] sm:$0xff]  ;;  %v1725_v23 = vld [vmem:[#allocation2 + $0x1a4] ss:$8 sps:$4 sm:$0xff]   ;;  %v1727_v24 = vld [vmem:[#allocation2 + $0x1a0] ss:$8 sps:$4 sm:$0xff]  }
  0x2d   :  { %906 = vmatprep.subr.bf16.mxu0 %v1701_v4  ;;  %v74_v15 = vpack.c.bf16 %v66_v14, %v58_v13  ;;  %v1716_v17 = vld [vmem:[#allocation2 + $0x174] ss:$8 sps:$4 sm:$0xff]   ;;  %v1718_v18 = vld [vmem:[#allocation2 + $0x170] ss:$8 sps:$4 sm:$0xff]   ;;  %v1788_v27 = vld [vmem:[#allocation2 + $0x4] ss:$8 sps:$4 sm:$0xff]  }
  0x2e   :  { %v1722_v21 = vld [vmem:[#allocation2 + $0x194] ss:$8 sps:$4 sm:$0xff]   ;;  %v1724_v22 = vld [vmem:[#allocation2 + $0x190] ss:$8 sps:$4 sm:$0xff]   ;;  %v1790_v28 = vld [vmem:[#allocation2] ss:$8 sps:$4 sm:$0xff]   ;;  %859 = vmatprep.subr.bf16.mxu1 %v1788_v27 }
  0x2f   :  { %934 = vmatprep.mubr.bf16.mxu0 %v74_v15  ;;  %v1728_v25 = vld [vmem:[#allocation2 + $0x1b4] ss:$8 sps:$4 sm:$0xff]   ;;  %v1730_v26 = vld [vmem:[#allocation2 + $0x1b0] ss:$8 sps:$4 sm:$0xff]   ;;  %v1731_v29 = vld [vmem:[#allocation2 + $0x1c4] ss:$8 sps:$4 sm:$0xff]   ;;  %860 = vmatpush1.bf16.msra.mxu1 %v1790_v28 }
  0x30   :  { %907 = vmatpush1.bf16.msra.mxu0 %v1703_v5  ;;  %v1794_v30 = vld [vmem:[#allocation2 + $0x14] ss:$8 sps:$4 sm:$0xff]   ;;  %v1796_v31 = vld [vmem:[#allocation2 + $0x10] ss:$8 sps:$4 sm:$0xff]   ;;  %v1733_v32 = vld [vmem:[#allocation2 + $0x1c0] ss:$8 sps:$4 sm:$0xff]  }
  0x31   :  { %908 = vmatprep.subr.bf16.mxu0 %v1704_v6  ;;  %v1734_v33 = vld [vmem:[#allocation2 + $0x1d4] ss:$8 sps:$4 sm:$0xff]   ;;  %861 = vmatprep.subr.bf16.mxu1 %v1794_v30  ;;  %v1800_v34 = vld [vmem:[#allocation2 + $0x24] ss:$8 sps:$4 sm:$0xff]   ;;  %v1802_v35 = vld [vmem:[#allocation2 + $0x20] ss:$8 sps:$4 sm:$0xff]  }
  0x32   :  { %v1736_v36 = vld [vmem:[#allocation2 + $0x1d0] ss:$8 sps:$4 sm:$0xff]   ;;  %v1737_v37 = vld [vmem:[#allocation2 + $0x1e4] ss:$8 sps:$4 sm:$0xff]   ;;  %v1806_v38 = vld [vmem:[#allocation2 + $0x34] ss:$8 sps:$4 sm:$0xff]  }
  0x33   :  { %862 = vmatpush1.bf16.msra.mxu1 %v1796_v31  ;;  %v1808_v39 = vld [vmem:[#allocation2 + $0x30] ss:$8 sps:$4 sm:$0xff]   ;;  %v1739_v40 = vld [vmem:[#allocation2 + $0x1e0] ss:$8 sps:$4 sm:$0xff]   ;;  %v1812_v41 = vld [vmem:[#allocation2 + $0x44] ss:$8 sps:$4 sm:$0xff]  }
  0x34   :  { %909 = vmatpush1.bf16.msra.mxu0 %v1706_v7  ;;  %863 = vmatprep.subr.bf16.mxu1 %v1800_v34  ;;  %v1740_v42 = vld [vmem:[#allocation2 + $0x1f4] ss:$8 sps:$4 sm:$0xff]   ;;  %v1742_v43 = vld [vmem:[#allocation2 + $0x1f0] ss:$8 sps:$4 sm:$0xff]   ;;  %v1745_v45 = vld [vmem:[#allocation2 + $0x204] ss:$8 sps:$4 sm:$0xff]  }
  0x35   :  { %910 = vmatprep.subr.bf16.mxu0 %v1707_v8  ;;  %v57_v44 = vld [vmem:[%s2228_s0 + $0x10] sm:$0xff]  ;;  %v1814_v47 = vld [vmem:[#allocation2 + $0x40] ss:$8 sps:$4 sm:$0xff]   ;;  %v1824_v56 = vld [vmem:[#allocation2 + $0x64] ss:$8 sps:$4 sm:$0xff]  }
  0x36   :  { %v65_v46 = vld [vmem:[%s2228_s0 + $0x50] sm:$0xff]  ;;  %v60_v48 = vld [vmem:[%s2228_s0 + $0x28] sm:$0xff]  ;;  %v63_v34 = vld [vmem:[%s2228_s0 + $0x40] sm:$0xff] }
  0x37   :  { %864 = vmatpush1.bf16.msra.mxu1 %v1802_v35  ;;  %v1818_v49 = vld [vmem:[#allocation2 + $0x54] ss:$8 sps:$4 sm:$0xff]   ;;  %v68_v50 = vld [vmem:[%s2228_s0 + $0x68] sm:$0xff]  ;;  %v73_v51 = vpack.c.bf16 %v65_v46, %v57_v44  ;;  %v1820_v52 = vld [vmem:[#allocation2 + $0x50] ss:$8 sps:$4 sm:$0xff]  }
  0x38   :  { %911 = vmatpush1.bf16.msra.mxu0 %v1709_v9  ;;  %865 = vmatprep.subr.bf16.mxu1 %v1806_v38  ;;  %v1743_v53 = vld [vmem:[#allocation2 + $0x200] ss:$8 sps:$4 sm:$0xff]   ;;  %v1748_v54 = vld [vmem:[#allocation2 + $0x214] ss:$8 sps:$4 sm:$0xff]   ;;  %v76_v55 = vpack.c.bf16 %v68_v50, %v60_v48  ;;  %v1746_v58 = vld [vmem:[#allocation2 + $0x210] ss:$8 sps:$4 sm:$0xff]  }
  0x39   :  { %912 = vmatprep.subr.bf16.mxu0 %v1710_v10  ;;  %v1826_v57 = vld [vmem:[#allocation2 + $0x60] ss:$8 sps:$4 sm:$0xff]   ;;  %v1830_v59 = vld [vmem:[#allocation2 + $0x74] ss:$8 sps:$4 sm:$0xff]   ;;  %v1751_v60 = vld [vmem:[#allocation2 + $0x224] ss:$8 sps:$4 sm:$0xff]  }
  0x3a   :  { %v1832_v61 = vld [vmem:[#allocation2 + $0x70] ss:$8 sps:$4 sm:$0xff]   ;;  %v1749_v62 = vld [vmem:[#allocation2 + $0x220] ss:$8 sps:$4 sm:$0xff]   ;;  %v1836_v63 = vld [vmem:[#allocation2 + $0x84] ss:$8 sps:$4 sm:$0xff]  }
  0x3b   :  { %866 = vmatpush1.bf16.msra.mxu1 %v1808_v39  ;;  %v1754_v0 = vld [vmem:[#allocation2 + $0x234] ss:$8 sps:$4 sm:$0xff]   ;;  %v1838_v1 = vld [vmem:[#allocation2 + $0x80] ss:$8 sps:$4 sm:$0xff]   ;;  %v1752_v2 = vld [vmem:[#allocation2 + $0x230] ss:$8 sps:$4 sm:$0xff]  }
  0x3c   :  { %913 = vmatpush1.bf16.msra.mxu0 %v1712_v11  ;;  %867 = vmatprep.subr.bf16.mxu1 %v1812_v41  ;;  %v1842_v3 = vld [vmem:[#allocation2 + $0x94] ss:$8 sps:$4 sm:$0xff]   ;;  %v1757_v4 = vld [vmem:[#allocation2 + $0x244] ss:$8 sps:$4 sm:$0xff]   ;;  %v1844_v5 = vld [vmem:[#allocation2 + $0x90] ss:$8 sps:$4 sm:$0xff]  }
  0x3d   :  { %914 = vmatprep.subr.bf16.mxu0 %v1713_v12  ;;  %v1755_v6 = vld [vmem:[#allocation2 + $0x240] ss:$8 sps:$4 sm:$0xff]   ;;  %v1848_v7 = vld [vmem:[#allocation2 + $0xa4] ss:$8 sps:$4 sm:$0xff]   ;;  %v1760_v8 = vld [vmem:[#allocation2 + $0x254] ss:$8 sps:$4 sm:$0xff]  }
  0x3e   :  { %v1850_v9 = vld [vmem:[#allocation2 + $0xa0] ss:$8 sps:$4 sm:$0xff]   ;;  %v1758_v10 = vld [vmem:[#allocation2 + $0x250] ss:$8 sps:$4 sm:$0xff]   ;;  %v1854_v11 = vld [vmem:[#allocation2 + $0xb4] ss:$8 sps:$4 sm:$0xff]  }
  0x3f   :  { %868 = vmatpush1.bf16.msra.mxu1 %v1814_v47  ;;  %v1763_v12 = vld [vmem:[#allocation2 + $0x264] ss:$8 sps:$4 sm:$0xff]   ;;  %v1856_v13 = vld [vmem:[#allocation2 + $0xb0] ss:$8 sps:$4 sm:$0xff]   ;;  %v1761_v15 = vld [vmem:[#allocation2 + $0x260] ss:$8 sps:$4 sm:$0xff]  }
  0x40   :  { %915 = vmatpush1.bf16.msra.mxu0 %v1715_v16  ;;  %869 = vmatprep.subr.bf16.mxu1 %v1818_v49  ;;  %v56_v14 = vld [vmem:[%s2228_s0 + $0x8] sm:$0xff]  ;;  %v1772_v27 = vld [vmem:[#allocation2 + $0x294] ss:$8 sps:$4 sm:$0xff]   ;;  %v1776_v38 = vld [vmem:[#allocation2 + $0x2b0] ss:$8 sps:$4 sm:$0xff]  }
  0x41   :  { %916 = vmatprep.subr.bf16.mxu0 %v1716_v17  ;;  %v1860_v16 = vld [vmem:[#allocation2 + $0xc4] ss:$8 sps:$4 sm:$0xff]   ;;  %v1874_v28 = vld [vmem:[#allocation2 + $0xe0] ss:$8 sps:$4 sm:$0xff]   ;;  %v1878_v30 = vld [vmem:[#allocation2 + $0xf4] ss:$8 sps:$4 sm:$0xff]  }
  0x42   :  { %v64_v17 = vld [vmem:[%s2228_s0 + $0x48] sm:$0xff]  ;;  %v1784_v46 = vld [vmem:[#allocation2 + $0x2d4] ss:$8 sps:$4 sm:$0xff]   ;;  %v1782_v48 = vld [vmem:[#allocation2 + $0x2d0] ss:$8 sps:$4 sm:$0xff]  }
  0x43   :  { %870 = vmatpush1.bf16.msra.mxu1 %v1820_v52  ;;  %v1775_v31 = vld [vmem:[#allocation2 + $0x2a4] ss:$8 sps:$4 sm:$0xff]   ;;  %v1773_v35 = vld [vmem:[#allocation2 + $0x2a0] ss:$8 sps:$4 sm:$0xff]   ;;  %v1898_v49 = vld [vmem:[%s2231_s3 + $0x34] ss:$8 sps:$4 sm:$0xff]  }
  0x44   :  { %917 = vmatpush1.bf16.msra.mxu0 %v1718_v18  ;;  %871 = vmatprep.subr.bf16.mxu1 %v1824_v56  ;;  %v1766_v18 = vld [vmem:[#allocation2 + $0x274] ss:$8 sps:$4 sm:$0xff]   ;;  %v1887_v41 = vld [vmem:[%s2231_s3] ss:$8 sps:$4 sm:$0xff]   ;;  %v1787_v50 = vld [vmem:[#allocation2 + $0x2e4] ss:$8 sps:$4 sm:$0xff]  }
  0x45   :  { %918 = vmatprep.subr.bf16.mxu0 %v1719_v19  ;;  %v72_v19 = vpack.c.bf16 %v64_v17, %v56_v14  ;;  %v1779_v44 = vld [vmem:[#allocation2 + $0x2c0] ss:$8 sps:$4 sm:$0xff]   ;;  %v1815_v14 = vld [vmem:[#allocation2 + $0x330] ss:$8 sps:$4 sm:$0xff]  }
  0x46   :  { %v1893_v47 = vld [vmem:[%s2231_s3 + $0x20] ss:$8 sps:$4 sm:$0xff]   ;;  %v1914_v17 = vld [vmem:[%s2231_s3 + $0x90] ss:$8 sps:$4 sm:$0xff]  }
  0x47   :  { %872 = vmatpush1.bf16.msra.mxu1 %v1826_v57  ;;  %891 = vmatprep.mubr.bf16.mxu1 %v72_v19  ;;  %v1785_v52 = vld [vmem:[#allocation2 + $0x2e0] ss:$8 sps:$4 sm:$0xff]   ;;  %v1919_v19 = vld [vmem:[%s2231_s3 + $0xa4] ss:$8 sps:$4 sm:$0xff]  }
  0x48   :  { %919 = vmatpush1.bf16.msra.mxu0 %v1721_v20  ;;  %873 = vmatprep.subr.bf16.mxu1 %v1830_v59  ;;  %v1862_v20 = vld [vmem:[#allocation2 + $0xc0] ss:$8 sps:$4 sm:$0xff]   ;;  %v1904_v59 = vld [vmem:[%s2231_s3 + $0x54] ss:$8 sps:$4 sm:$0xff]  }
  0x49   :  { %920 = vmatprep.subr.bf16.mxu0 %v1722_v21  ;;  %v1764_v21 = vld [vmem:[#allocation2 + $0x270] ss:$8 sps:$4 sm:$0xff]   ;;  %v1899_v56 = vld [vmem:[%s2231_s3 + $0x40] ss:$8 sps:$4 sm:$0xff]  }
  0x4a   :  { %v59_v57 = vld [vmem:[%s2228_s0 + $0x20] sm:$0xff] }
  0x4b   :  { %874 = vmatpush1.bf16.msra.mxu1 %v1832_v61  ;;  %v62_v61 = vld [vmem:[%s2228_s0 + $0x38] sm:$0xff] }
  0x4c   :  { %921 = vmatpush1.bf16.msra.mxu0 %v1724_v22  ;;  %875 = vmatprep.subr.bf16.mxu1 %v1836_v63  ;;  %v1866_v22 = vld [vmem:[#allocation2 + $0xd4] ss:$8 sps:$4 sm:$0xff]  }
  0x4d   :  { %922 = vmatprep.subr.bf16.mxu0 %v1725_v23  ;;  %v1769_v23 = vld [vmem:[#allocation2 + $0x284] ss:$8 sps:$4 sm:$0xff]  }
  0x4f   :  { %876 = vmatpush1.bf16.msra.mxu1 %v1838_v1  ;;  %v1797_v1 = vld [vmem:[#allocation2 + $0x300] ss:$8 sps:$4 sm:$0xff]  }
  0x50   :  { %923 = vmatpush1.bf16.msra.mxu0 %v1727_v24  ;;  %877 = vmatprep.subr.bf16.mxu1 %v1842_v3  ;;  %v1868_v24 = vld [vmem:[#allocation2 + $0xd0] ss:$8 sps:$4 sm:$0xff]   ;;  %v1805_v3 = vld [vmem:[#allocation2 + $0x314] ss:$8 sps:$4 sm:$0xff]  }
  0x51   :  { %924 = vmatprep.subr.bf16.mxu0 %v1728_v25  ;;  %v1767_v25 = vld [vmem:[#allocation2 + $0x280] ss:$8 sps:$4 sm:$0xff]  }
  0x53   :  { %878 = vmatpush1.bf16.msra.mxu1 %v1844_v5  ;;  %v1905_v5 = vld [vmem:[%s2231_s3 + $0x60] ss:$8 sps:$4 sm:$0xff]  }
  0x54   :  { %925 = vmatpush1.bf16.msra.mxu0 %v1730_v26  ;;  %879 = vmatprep.subr.bf16.mxu1 %v1848_v7  ;;  %v1872_v26 = vld [vmem:[#allocation2 + $0xe4] ss:$8 sps:$4 sm:$0xff]   ;;  %v1910_v7 = vld [vmem:[%s2231_s3 + $0x74] ss:$8 sps:$4 sm:$0xff]  }
  0x55   :  { %926 = vmatprep.subr.bf16.mxu0 %v1731_v29  ;;  %v1770_v29 = vld [vmem:[#allocation2 + $0x290] ss:$8 sps:$4 sm:$0xff]  }
  0x57   :  { %880 = vmatpush1.bf16.msra.mxu1 %v1850_v9  ;;  %v1908_v9 = vld [vmem:[%s2231_s3 + $0x70] ss:$8 sps:$4 sm:$0xff]  }
  0x58   :  { %927 = vmatpush1.bf16.msra.mxu0 %v1733_v32  ;;  %881 = vmatprep.subr.bf16.mxu1 %v1854_v11  ;;  %v1880_v32 = vld [vmem:[#allocation2 + $0xf0] ss:$8 sps:$4 sm:$0xff]   ;;  %v1913_v11 = vld [vmem:[%s2231_s3 + $0x84] ss:$8 sps:$4 sm:$0xff]  }
  0x59   :  { %928 = vmatprep.subr.bf16.mxu0 %v1734_v33  ;;  %v55_v33 = vld [vmem:[%s2228_s0] sm:$0xff] }
  0x5a   :  { %v71_v39 = vpack.c.bf16 %v63_v34, %v55_v33  ;;  %v1859_v33 = vld [vmem:[#allocation2 + $0x3a4] ss:$8 sps:$4 sm:$0xff]   ;;  %v1857_v34 = vld [vmem:[#allocation2 + $0x3a0] ss:$8 sps:$4 sm:$0xff]  }
  0x5b   :  { %882 = vmatpush1.bf16.msra.mxu1 %v1856_v13  ;;  %v1911_v13 = vld [vmem:[%s2231_s3 + $0x80] ss:$8 sps:$4 sm:$0xff]  }
  0x5c   :  { %929 = vmatpush1.bf16.msra.mxu0 %v1736_v36  ;;  %883 = vmatprep.subr.bf16.mxu1 %v1860_v16  ;;  %v1889_v36 = vld [vmem:[%s2231_s3 + $0x4] ss:$8 sps:$4 sm:$0xff]  }
  0x5d   :  { %930 = vmatprep.subr.bf16.mxu0 %v1737_v37  ;;  %v1778_v37 = vld [vmem:[#allocation2 + $0x2b4] ss:$8 sps:$4 sm:$0xff]   ;;  %v1823_v16 = vld [vmem:[#allocation2 + $0x344] ss:$8 sps:$4 sm:$0xff]  }
  0x5f   :  { %884 = vmatpush1.bf16.msra.mxu1 %v1862_v20  ;;  %v1829_v20 = vld [vmem:[#allocation2 + $0x354] ss:$8 sps:$4 sm:$0xff]  }
  0x60   :  { %931 = vmatpush1.bf16.msra.mxu0 %v1739_v40  ;;  %885 = vmatprep.subr.bf16.mxu1 %v1866_v22  ;;  %v1781_v40 = vld [vmem:[#allocation2 + $0x2c4] ss:$8 sps:$4 sm:$0xff]   ;;  %v1827_v22 = vld [vmem:[#allocation2 + $0x350] ss:$8 sps:$4 sm:$0xff]  }
  0x61   :  { %932 = vmatprep.subr.bf16.mxu0 %v1740_v42  ;;  %v1892_v42 = vld [vmem:[%s2231_s3 + $0x14] ss:$8 sps:$4 sm:$0xff]  }
  0x63   :  { %886 = vmatpush1.bf16.msra.mxu1 %v1868_v24  ;;  %v1835_v24 = vld [vmem:[#allocation2 + $0x364] ss:$8 sps:$4 sm:$0xff]  }
  0x64   :  { %933 = vmatpush1.bf16.msra.mxu0 %v1742_v43  ;;  %887 = vmatprep.subr.bf16.mxu1 %v1872_v26  ;;  %v1890_v43 = vld [vmem:[%s2231_s3 + $0x10] ss:$8 sps:$4 sm:$0xff]   ;;  %v1833_v26 = vld [vmem:[#allocation2 + $0x360] ss:$8 sps:$4 sm:$0xff]  }
  0x65   :  { %945 = vmatprep.subr.bf16.mxu0 %v1745_v45  ;;  %v1895_v45 = vld [vmem:[%s2231_s3 + $0x24] ss:$8 sps:$4 sm:$0xff]  }
  0x67   :  { %935 = vmatmul.mubr.bf16.vlgmr.msra.gmra.mrb[0].mxu0 %v73_v51  ;;  %888 = vmatpush1.bf16.msra.mxu1 %v1874_v28  ;;  %v1896_v51 = vld [vmem:[%s2231_s3 + $0x30] ss:$8 sps:$4 sm:$0xff]  }
  0x68   :  { %946 = vmatpush1.bf16.msra.mxu0 %v1743_v53  ;;  %977 = vmatprep.mubr.bf16.mxu0 %v76_v55  ;;  %v1901_v53 = vld [vmem:[%s2231_s3 + $0x44] ss:$8 sps:$4 sm:$0xff]   ;;  %v1791_v55 = vld [vmem:[#allocation2 + $0x2f0] ss:$8 sps:$4 sm:$0xff]  }
  0x69   :  { %947 = vmatprep.subr.bf16.mxu0 %v1748_v54  ;;  %889 = vmatprep.subr.bf16.mxu1 %v1878_v30  ;;  %v1793_v54 = vld [vmem:[#allocation2 + $0x2f4] ss:$8 sps:$4 sm:$0xff]   ;;  %v1839_v28 = vld [vmem:[#allocation2 + $0x370] ss:$8 sps:$4 sm:$0xff]   ;;  %v1845_v30 = vld [vmem:[#allocation2 + $0x380] ss:$8 sps:$4 sm:$0xff]  }
  0x6b   :  { %890 = vmatpush1.bf16.msra.mxu1 %v1880_v32  ;;  %v1851_v32 = vld [vmem:[#allocation2 + $0x390] ss:$8 sps:$4 sm:$0xff]  }
  0x6c   :  { %948 = vmatpush1.bf16.msra.mxu0 %v1746_v58  ;;  %1241 = vmatprep.subr.bf16.mxu1 %v1889_v36  ;;  %v67_v58 = vld [vmem:[%s2228_s0 + $0x60] sm:$0xff]  ;;  %v1863_v36 = vld [vmem:[#allocation2 + $0x3b0] ss:$8 sps:$4 sm:$0xff]  }
  0x6d   :  { %949 = vmatprep.subr.bf16.mxu0 %v1751_v60  ;;  %v1799_v60 = vld [vmem:[#allocation2 + $0x304] ss:$8 sps:$4 sm:$0xff]   ;;  %v75_v63 = vpack.c.bf16 %v67_v58, %v59_v57 }
  0x6e   :  { %892 = vmatmul.mubr.bf16.vlgmr.msra.gmra.mrb[0].mxu1 %v71_v39  ;;  %v1877_v39 = vld [vmem:[#allocation2 + $0x3d4] ss:$8 sps:$4 sm:$0xff]  }
  0x6f   :  { %1242 = vmatpush1.bf16.msra.mxu1 %v1887_v41  ;;  %v1883_v41 = vld [vmem:[#allocation2 + $0x3e4] ss:$8 sps:$4 sm:$0xff]  }
  0x70   :  { %950 = vmatpush1.bf16.msra.mxu0 %v1749_v62  ;;  %1243 = vmatprep.subr.bf16.mxu1 %v1892_v42  ;;  %v70_v62 = vld [vmem:[%s2228_s0 + $0x78] sm:$0xff]  ;;  %v1881_v42 = vld [vmem:[#allocation2 + $0x3e0] ss:$8 sps:$4 sm:$0xff]  }
  0x71   :  { %951 = vmatprep.subr.bf16.mxu0 %v1754_v0  ;;  %v1902_v0 = vld [vmem:[%s2231_s3 + $0x50] ss:$8 sps:$4 sm:$0xff]  }
  0x73   :  { %1244 = vmatpush1.bf16.msra.mxu1 %v1890_v43  ;;  %v1886_v43 = vld [vmem:[#allocation2 + $0x3f4] ss:$8 sps:$4 sm:$0xff]  }
  0x74   :  { %952 = vmatpush1.bf16.msra.mxu0 %v1752_v2  ;;  %1245 = vmatprep.subr.bf16.mxu1 %v1895_v45  ;;  %v78_v2 = vpack.c.bf16 %v70_v62, %v62_v61  ;;  %v61_v45 = vld [vmem:[%s2228_s0 + $0x30] sm:$0xff]  ;;  %v209_v61 = vlaneseq }
  0x75   :  { %953 = vmatprep.subr.bf16.mxu0 %v1757_v4  ;;  %v1907_v4 = vld [vmem:[%s2231_s3 + $0x64] ss:$8 sps:$4 sm:$0xff]  }
  0x76   :  { %v210_v62 = vshrl.u32 %v209_v61, 7 }
  0x77   :  { %1246 = vmatpush1.bf16.msra.mxu1 %v1893_v47 }
  0x78   :  { %954 = vmatpush1.bf16.msra.mxu0 %v1755_v6  ;;  %1247 = vmatprep.subr.bf16.mxu1 %v1898_v49  ;;  %v1803_v6 = vld [vmem:[#allocation2 + $0x310] ss:$8 sps:$4 sm:$0xff]   ;;  %v1925_v49 = vld [vmem:[%s2231_s3 + $0xc4] ss:$8 sps:$4 sm:$0xff]  }
  0x79   :  { %955 = vmatprep.subr.bf16.mxu0 %v1760_v8  ;;  %v1811_v8 = vld [vmem:[#allocation2 + $0x324] ss:$8 sps:$4 sm:$0xff]  }
  0x7b   :  { %1248 = vmatpush1.bf16.msra.mxu1 %v1896_v51  ;;  %v1928_v51 = vld [vmem:[%s2231_s3 + $0xd4] ss:$8 sps:$4 sm:$0xff]  }
  0x7c   :  { %956 = vmatpush1.bf16.msra.mxu0 %v1758_v10  ;;  %1249 = vmatprep.subr.bf16.mxu1 %v1901_v53  ;;  %v1809_v10 = vld [vmem:[#allocation2 + $0x320] ss:$8 sps:$4 sm:$0xff]  }
  0x7d   :  { %957 = vmatprep.subr.bf16.mxu0 %v1763_v12  ;;  %v1817_v12 = vld [vmem:[#allocation2 + $0x334] ss:$8 sps:$4 sm:$0xff]   ;;  %v1929_v53 = vld [vmem:[%s2231_s3 + $0xe0] ss:$8 sps:$4 sm:$0xff]  }
  0x7f   :  { %1250 = vmatpush1.bf16.msra.mxu1 %v1899_v56  ;;  %v1935_v56 = vld [vmem:[#allocation4 + $0x40] sm:$0xff]  }
  0x80   :  { %958 = vmatpush1.bf16.msra.mxu0 %v1761_v15  ;;  %1251 = vmatprep.subr.bf16.mxu1 %v1904_v59  ;;  %v1916_v15 = vld [vmem:[%s2231_s3 + $0x94] ss:$8 sps:$4 sm:$0xff]  }
  0x81   :  { %959 = vmatprep.subr.bf16.mxu0 %v1766_v18  ;;  %v1821_v18 = vld [vmem:[#allocation2 + $0x340] ss:$8 sps:$4 sm:$0xff]  }
  0x83   :  { %1252 = vmatpush1.bf16.msra.mxu1 %v1902_v0  ;;  %v207_v0 = vld [vmem:[%s2230_s2] sm:$0x3] }
  0x84   :  { %960 = vmatpush1.bf16.msra.mxu0 %v1764_v21  ;;  %1253 = vmatprep.subr.bf16.mxu1 %v1907_v4  ;;  %v1917_v21 = vld [vmem:[%s2231_s3 + $0xa0] ss:$8 sps:$4 sm:$0xff]  }
  0x85   :  { %961 = vmatprep.subr.bf16.mxu0 %v1769_v23  ;;  %v1922_v23 = vld [vmem:[%s2231_s3 + $0xb4] ss:$8 sps:$4 sm:$0xff]  }
  0x87   :  { %1254 = vmatpush1.bf16.msra.mxu1 %v1905_v5 }
  0x88   :  { %962 = vmatpush1.bf16.msra.mxu0 %v1767_v25  ;;  %1255 = vmatprep.subr.bf16.mxu1 %v1910_v7  ;;  %v1920_v25 = vld [vmem:[%s2231_s3 + $0xb0] ss:$8 sps:$4 sm:$0xff]  }
  0x89   :  { %963 = vmatprep.subr.bf16.mxu0 %v1772_v27  ;;  %v1841_v27 = vld [vmem:[#allocation2 + $0x374] ss:$8 sps:$4 sm:$0xff]  }
  0x8b   :  { %1256 = vmatpush1.bf16.msra.mxu1 %v1908_v9 }
  0x8c   :  { %964 = vmatpush1.bf16.msra.mxu0 %v1770_v29  ;;  %1257 = vmatprep.subr.bf16.mxu1 %v1913_v11  ;;  %v1847_v29 = vld [vmem:[#allocation2 + $0x384] ss:$8 sps:$4 sm:$0xff]  }
  0x8d   :  { %965 = vmatprep.subr.bf16.mxu0 %v1775_v31  ;;  %v1853_v31 = vld [vmem:[#allocation2 + $0x394] ss:$8 sps:$4 sm:$0xff]  }
  0x8f   :  { %1258 = vmatpush1.bf16.msra.mxu1 %v1911_v13 }
  0x90   :  { %966 = vmatpush1.bf16.msra.mxu0 %v1773_v35  ;;  %1259 = vmatprep.subr.bf16.mxu1 %v1916_v15  ;;  %v1865_v35 = vld [vmem:[#allocation2 + $0x3b4] ss:$8 sps:$4 sm:$0xff]  }
  0x91   :  { %967 = vmatprep.subr.bf16.mxu0 %v1778_v37  ;;  %v1871_v37 = vld [vmem:[#allocation2 + $0x3c4] ss:$8 sps:$4 sm:$0xff]  }
  0x93   :  { %1260 = vmatpush1.bf16.msra.mxu1 %v1914_v17 }
  0x94   :  { %968 = vmatpush1.bf16.msra.mxu0 %v1776_v38  ;;  %1261 = vmatprep.subr.bf16.mxu1 %v1919_v19  ;;  %v1869_v38 = vld [vmem:[#allocation2 + $0x3c0] ss:$8 sps:$4 sm:$0xff]  }
  0x95   :  { %969 = vmatprep.subr.bf16.mxu0 %v1781_v40  ;;  %v1875_v40 = vld [vmem:[#allocation2 + $0x3d0] ss:$8 sps:$4 sm:$0xff]  }
  0x97   :  { %1262 = vmatpush1.bf16.msra.mxu1 %v1917_v21 }
  0x98   :  { %970 = vmatpush1.bf16.msra.mxu0 %v1779_v44  ;;  %1263 = vmatprep.subr.bf16.mxu1 %v1922_v23  ;;  %v1884_v44 = vld [vmem:[#allocation2 + $0x3f0] ss:$8 sps:$4 sm:$0xff]   ;;  %v1937_v23 = vld [vmem:[#allocation4 + $0x48] sm:$0xff]  }
  0x99   :  { %971 = vmatprep.subr.bf16.mxu0 %v1784_v46  ;;  %v69_v46 = vld [vmem:[%s2228_s0 + $0x70] sm:$0xff] }
  0x9a   :  { %v77_v47 = vpack.c.bf16 %v69_v46, %v61_v45 }
  0x9b   :  { %1264 = vmatpush1.bf16.msra.mxu1 %v1920_v25  ;;  %v1939_v25 = vld [vmem:[#allocation4 + $0x50] sm:$0xff]  }
  0x9c   :  { %972 = vmatpush1.bf16.msra.mxu0 %v1782_v48  ;;  %v1923_v48 = vld [vmem:[%s2231_s3 + $0xc0] ss:$8 sps:$4 sm:$0xff]   ;;  %1265 = vmatprep.subr.bf16.mxu1 %v1925_v49 }
  0x9d   :  { %973 = vmatprep.subr.bf16.mxu0 %v1787_v50  ;;  %v1926_v50 = vld [vmem:[%s2231_s3 + $0xd0] ss:$8 sps:$4 sm:$0xff]  }
  0x9f   :  { %1266 = vmatpush1.bf16.msra.mxu1 %v1923_v48 }
  0xa0   :  { %974 = vmatpush1.bf16.msra.mxu0 %v1785_v52  ;;  %1267 = vmatprep.subr.bf16.mxu1 %v1928_v51  ;;  %v1931_v52 = vld [vmem:[%s2231_s3 + $0xe4] ss:$8 sps:$4 sm:$0xff]  }
  0xa1   :  { %975 = vmatprep.subr.bf16.mxu0 %v1793_v54  ;;  %v1934_v54 = vld [vmem:[%s2231_s3 + $0xf4] ss:$8 sps:$4 sm:$0xff]  }
  0xa3   :  { %1268 = vmatpush1.bf16.msra.mxu1 %v1926_v50 }
  0xa4   :  { %976 = vmatpush1.bf16.msra.mxu0 %v1791_v55  ;;  %1269 = vmatprep.subr.bf16.mxu1 %v1931_v52  ;;  %v1932_v55 = vld [vmem:[%s2231_s3 + $0xf0] ss:$8 sps:$4 sm:$0xff]  }
  0xa5   :  { %988 = vmatprep.subr.bf16.mxu0 %v1799_v60 }
  0xa7   :  { %978 = vmatmul.mubr.bf16.vlgmr.msra.gmra.mrb[0].mxu0 %v75_v63  ;;  %1270 = vmatpush1.bf16.msra.mxu1 %v1929_v53  ;;  %v211_v63 = vsub.s32 0, %v210_v62 }
  0xa8   :  { %989 = vmatpush1.bf16.msra.mxu0 %v1797_v1  ;;  %1020 = vmatprep.mubr.bf16.mxu0 %v78_v2  ;;  %v215_v1 = vsub.s32 1, %v210_v62 }
  0xa9   :  { %990 = vmatprep.subr.bf16.mxu0 %v1805_v3  ;;  %1271 = vmatprep.subr.bf16.mxu1 %v1934_v54  ;;  %v212_v2 = vrot.slane %v207_v0, %v211_v63 }
  0xaa   :  { %v216_v3 = vrot.slane %v207_v0, %v215_v1 }
  0xab   :  { %1272 = vmatpush1.bf16.msra.mxu1 %v1932_v55  ;;  %v1634_v55 = vld [vmem:[%s2234_s6] ss:$0 sm:$0xff] }
  0xac   :  { %991 = vmatpush1.bf16.msra.mxu0 %v1803_v6  ;;  %1651 = vmatprep.subr.bf16.mxu1 %v1935_v56 }
  0xad   :  { %992 = vmatprep.subr.bf16.mxu0 %v1811_v8 }
  0xb0   :  { %993 = vmatpush1.bf16.msra.mxu0 %v1809_v10 }
  0xb1   :  { %994 = vmatprep.subr.bf16.mxu0 %v1817_v12 }
  0xb4   :  { %995 = vmatpush1.bf16.msra.mxu0 %v1815_v14 }
  0xb5   :  { %996 = vmatprep.subr.bf16.mxu0 %v1823_v16 }
  0xb8   :  { %997 = vmatpush1.bf16.msra.mxu0 %v1821_v18 }
  0xb9   :  { %998 = vmatprep.subr.bf16.mxu0 %v1829_v20 }
  0xbc   :  { %999 = vmatpush1.bf16.msra.mxu0 %v1827_v22  ;;  %v1936_v22 = vld [vmem:[#allocation4] sm:$0xff]  }
  0xbd   :  { %1000 = vmatprep.subr.bf16.mxu0 %v1835_v24  ;;  %v1938_v24 = vld [vmem:[#allocation4 + $0x8] sm:$0xff]  }
  0xc0   :  { %1001 = vmatpush1.bf16.msra.mxu0 %v1833_v26  ;;  %v1940_v26 = vld [vmem:[#allocation4 + $0x10] sm:$0xff]  }
  0xc1   :  { %1002 = vmatprep.subr.bf16.mxu0 %v1841_v27  ;;  %v1941_v27 = vld [vmem:[#allocation4 + $0x58] sm:$0xff]  }
  0xc4   :  { %1003 = vmatpush1.bf16.msra.mxu0 %v1839_v28  ;;  %v1942_v28 = vld [vmem:[#allocation4 + $0x18] sm:$0xff]  }
  0xc5   :  { %1004 = vmatprep.subr.bf16.mxu0 %v1847_v29  ;;  %v1943_v29 = vld [vmem:[#allocation4 + $0x60] sm:$0xff]  }
  0xc8   :  { %1005 = vmatpush1.bf16.msra.mxu0 %v1845_v30  ;;  %v1944_v30 = vld [vmem:[#allocation4 + $0x20] sm:$0xff]  }
  0xc9   :  { %1006 = vmatprep.subr.bf16.mxu0 %v1853_v31  ;;  %v1945_v31 = vld [vmem:[#allocation4 + $0x68] sm:$0xff]  }
  0xcc   :  { %1007 = vmatpush1.bf16.msra.mxu0 %v1851_v32  ;;  %v1946_v32 = vld [vmem:[#allocation4 + $0x28] sm:$0xff]  }
  0xcd   :  { %1008 = vmatprep.subr.bf16.mxu0 %v1859_v33  ;;  %v1947_v33 = vld [vmem:[#allocation4 + $0x70] sm:$0xff]  }
  0xd0   :  { %1009 = vmatpush1.bf16.msra.mxu0 %v1857_v34  ;;  %v1948_v34 = vld [vmem:[#allocation4 + $0x30] sm:$0xff]  }
  0xd1   :  { %1010 = vmatprep.subr.bf16.mxu0 %v1865_v35  ;;  %v1949_v35 = vld [vmem:[#allocation4 + $0x78] sm:$0xff]  }
  0xd4   :  { %1011 = vmatpush1.bf16.msra.mxu0 %v1863_v36  ;;  %v1950_v36 = vld [vmem:[#allocation4 + $0x38] sm:$0xff]  }
  0xd5   :  { %1012 = vmatprep.subr.bf16.mxu0 %v1871_v37  ;;  %v1069_v37 = vld [vmem:[%s2232_s4] sm:$0x3] }
  0xd8   :  { %1013 = vmatpush1.bf16.msra.mxu0 %v1869_v38  ;;  %v1074_v38 = vrot.slane %v1069_v37, %v211_v63 }
  0xd9   :  { %1014 = vmatprep.subr.bf16.mxu0 %v1877_v39  ;;  %v1078_v39 = vrot.slane %v1069_v37, %v215_v1 }
  0xdc   :  { %1015 = vmatpush1.bf16.msra.mxu0 %v1875_v40 }
  0xdd   :  { %1016 = vmatprep.subr.bf16.mxu0 %v1883_v41 }
  0xe0   :  { %1017 = vmatpush1.bf16.msra.mxu0 %v1881_v42 }
  0xe1   :  { %1018 = vmatprep.subr.bf16.mxu0 %v1886_v43 }
  0xe4   :  { %1019 = vmatpush1.bf16.msra.mxu0 %v1884_v44 }
  0xe7   :  { %1021 = vmatmul.mubr.bf16.vlgmr.msra.gmra.mrb[0].mxu0 %v77_v47 }
 0x141   :  { %v893_v57 = vpop.f32.mrb[0].mxu1 }
 0x142   :  { %v895_v58 = vpop.f32.mrb[1].mxu1  ;;  %v894_v4 = vadd.f32 %v893_v57, %v212_v2 }
 0x143   :  { %v897_v59 = vpop.f32.mrb[2].mxu1  ;;  %v896_v5 = vadd.f32 %v895_v58, %v216_v3 }
 0x144   :  { %v899_v60 = vpop.f32.mrb[3].mxu1  ;;  %v898_v7 = vadd.f32 %v897_v59, %v212_v2 }
 0x145   :  { %v900_v10 = vadd.f32 %v899_v60, %v216_v3 }
 0x1ba   :  { %v1022_v6 = vpop.f32.mrb[0].mxu0 }
 0x1bb   :  { %v1674_v8 = vadd.f32 %v1022_v6, %v894_v4  ;;  %v1024_v9 = vpop.f32.mrb[1].mxu0 }
 0x1bc   :  { %v1676_v11 = vadd.f32 %v1024_v9, %v896_v5  ;;  %v1026_v12 = vpop.f32.mrb[2].mxu0 }
 0x1bd   :  { %v1678_v13 = vadd.f32 %v1026_v12, %v898_v7  ;;  %v1028_v14 = vpop.f32.mrb[3].mxu0  ;;  %v1031_v16 = vmax.f32 %v1674_v8, 0.0 }
 0x1be   :  { %v1680_v15 = vadd.f32 %v1028_v14, %v900_v10  ;;  %v1032_v18 = vmax.f32 %v1676_v11, 0.0 }
 0x1bf   :  { %v1033_v17 = vmax.f32 %v1678_v13, 0.0 }
 0x1c0   :  { %v1034_v19 = vmax.f32 %v1680_v15, 0.0 }
 0x1c1   :  { %v1035_v20 = vpack.c.bf16 %v1033_v17, %v1031_v16 }
 0x1c2   :  { %v1036_v21 = vpack.c.bf16 %v1034_v19, %v1032_v18 }
 0x1c4   :  { %1273 = vmatprep.mubr.bf16.mxu1 %v1036_v21 }
 0x1c5   :  { %1274 = vmatmul.mubr.bf16.vlgmr.msra.gmra.mrb[4].mxu1 %v1035_v20 }
 0x1c6   :  { %1652 = vmatpush3.bf16.msra.mxu1 %v1936_v22 }
 0x1c7   :  { %1653 = vmatprep.subr.bf16.mxu1 %v1937_v23 }
 0x1ca   :  { %1654 = vmatpush3.bf16.msra.mxu1 %v1938_v24 }
 0x1cb   :  { %1655 = vmatprep.subr.bf16.mxu1 %v1939_v25 }
 0x1ce   :  { %1656 = vmatpush3.bf16.msra.mxu1 %v1940_v26 }
 0x1cf   :  { %1657 = vmatprep.subr.bf16.mxu1 %v1941_v27 }
 0x1d2   :  { %1658 = vmatpush3.bf16.msra.mxu1 %v1942_v28 }
 0x1d3   :  { %1659 = vmatprep.subr.bf16.mxu1 %v1943_v29 }
 0x1d6   :  { %1660 = vmatpush3.bf16.msra.mxu1 %v1944_v30 }
 0x1d7   :  { %1661 = vmatprep.subr.bf16.mxu1 %v1945_v31 }
 0x1da   :  { %1662 = vmatpush3.bf16.msra.mxu1 %v1946_v32 }
 0x1db   :  { %1663 = vmatprep.subr.bf16.mxu1 %v1947_v33 }
 0x1de   :  { %1664 = vmatpush3.bf16.msra.mxu1 %v1948_v34 }
 0x1df   :  { %1665 = vmatprep.subr.bf16.mxu1 %v1949_v35 }
 0x1e2   :  { %1666 = vmatpush3.bf16.msra.mxu1 %v1950_v36 }
 0x298   :  { %v1275_v40 = vpop.f32.mrb[4].mxu1 }
 0x299   :  { %v1276_v41 = vadd.f32 %v1275_v40, %v1074_v38  ;;  %v1277_v42 = vpop.f32.mrb[5].mxu1 }
 0x29a   :  { %v1278_v43 = vadd.f32 %v1277_v42, %v1078_v39  ;;  %v1279_v44 = vpop.f32.mrb[6].mxu1 }
 0x29b   :  { %v1280_v45 = vadd.f32 %v1279_v44, %v1074_v38  ;;  %v1281_v46 = vpop.f32.mrb[7].mxu1  ;;  %v1284_v48 = vmax.f32 %v1276_v41, 0.0 }
 0x29c   :  { %v1282_v47 = vadd.f32 %v1281_v46, %v1078_v39  ;;  %v1285_v50 = vmax.f32 %v1278_v43, 0.0 }
 0x29d   :  { %v1286_v49 = vmax.f32 %v1280_v45, 0.0 }
 0x29e   :  { %v1287_v51 = vmax.f32 %v1282_v47, 0.0 }
 0x29f   :  { %v1288_v52 = vpack.c.bf16 %v1286_v49, %v1284_v48 }
 0x2a0   :  { %v1289_v53 = vpack.c.bf16 %v1287_v51, %v1285_v50 }
 0x2a2   :  { %1457 = vmatprep.mubr.bf16.mxu1 %v1289_v53 }
 0x2a3   :  { %1458 = vmatmul.mubr.bf16.vlgmr.msra.gmra.mrb[8].mxu1 %v1288_v52 }
 0x376   :  { %v1667_v54 = vpop.f32.mrb[8].mxu1 }
 0x377   :  { %v1668_v56 = vpop.f32.mrb[9].mxu1 }
 0x378   :  { %v1669_v57 = vadd.f32 %v1668_v56, %v1667_v54  ;;  %v1670_v58 = vpop.f32.mrb[10].mxu1 }
 0x379   :  { %v1671_v59 = vpop.f32.mrb[11].mxu1 }
 0x37a   :  { %v1460_v60 = vadd.f32 %v1669_v57, %v1634_v55  ;;  %v1672_v61 = vadd.f32 %v1671_v59, %v1670_v58 }
 0x37c   :  { %1466 = vst [vmem:[%s2235_s7] sm:$0xff] %v1460_v60  ;;  %v1463_v62 = vadd.f32 %v1672_v61, %v1634_v55 }
 0x37e   :  { %1467 = vst [vmem:[%s2235_s7 + $0x8] sm:$0xff] %v1463_v62 }
 0x37f   :  { %1472 = vsyncpa [#allocation3], 1 }
 0x380   :  { %1473 = vsyncpa [#allocation5], 1 }

</bundles_post_ra>
